<compile_context>
chip_gen: v6e
topology: v6e:2x2x1
jax: 0.10.0
libtpu: 0.0.40
codegen_flags: <defaults>
</compile_context>

<pallas_src>
import jax
import jax.numpy as jnp
import numpy as np
from jax.experimental import pallas as pl
from jax.experimental.pallas import tpu as pltpu


def _fused_gcn_kernel(p_ref, w_ref, b_ref, o_ref):
    # p_ref : (pool, TILE_M, E*K)  bf16 im2col rows; p_ref[q, r] is the q-th conv
    #         window of pooling-window r (r = b*W_pool + j): all partners of a
    #         pooling window share the same row index r.
    # w_ref : (E*K, N_PAD)         bf16 Conv2d weight with adj folded in; channel
    #                              axis zero-padded to a multiple of 128.
    # b_ref : (1, N_PAD)           f32 Conv2d bias (zero in padded columns).
    # o_ref : (TILE_M, N_PAD)      f32 sqrt(sum of squares) per pooling window.
    pool = p_ref.shape[0]                       # small static int
    w = w_ref[...]
    b = b_ref[...]
    pooled = None
    for q in range(pool):
        conv = jnp.dot(p_ref[q], w, preferred_element_type=jnp.float32)  # MXU, f32 acc
        act = jnp.tanh(conv + b)                                         # EUP, f32
        sq = act * act                                                   # VPU
        pooled = sq if pooled is None else pooled + sq
    # LPPool1d(norm_type=2) == sqrt of the per-window sum of squares.
    o_ref[...] = jnp.sqrt(pooled).astype(o_ref.dtype)   # lane-dense 128-wide store


def graph_convolution_forward(x, adj, weight, bias, pool, *, max_tile_m=512):
    B, E, T = x.shape
    emb_dim = weight.shape[0]
    K = weight.shape[3]
    assert weight.shape == (emb_dim, 1, E, K)

    W = (T - K) // K + 1              # Conv2d output width (stride == K, no padding)
    W_pool = (W - pool) // pool + 1   # LPPool1d output length (stride == kernel_size)
    W_used = W_pool * pool            # only these conv windows feed the pooling
    rows_out = B * W_pool
    EK = E * K

    # Lane-dense output: pad the channel axis up to a multiple of 128.
    n_pad = ((emb_dim + 127) // 128) * 128

    # Fold adj into the conv weight (tiny einsum, once per call):
    #   w_eff[f*K + k, c] = sum_e adj[e, f] * weight[c, 0, e, k]
    w_eff = jnp.einsum("ef,cek->fkc", adj, weight[:, 0]).reshape(EK, emb_dim)
    w_eff = jnp.pad(w_eff, ((0, 0), (0, n_pad - emb_dim))).astype(jnp.bfloat16)
    b_row = jnp.pad(bias.reshape(1, emb_dim).astype(jnp.float32),
                    ((0, 0), (0, n_pad - emb_dim)))

    # Row tiling: multiple of 8 sublanes; rows zero-padded and sliced off afterwards.
    rows8 = ((rows_out + 7) // 8) * 8
    tile_m = min(max_tile_m, rows8)
    rows_padded = ((rows_out + tile_m - 1) // tile_m) * tile_m
    num_tiles = rows_padded // tile_m

    # im2col of x (kernel height == E, stride == kernel width -> non-overlapping time
    # windows), rows reordered so the p-th member of every pooling window is slab p.
    # TODO(synk): at real B/T, feed x straight into the kernel via a BlockSpec over the
    # time axis and do the (E, W, K) -> (W, E*K) fixup in-kernel (XLU) to avoid writing
    # a same-size patches array back to HBM.
    xw = x[:, :, : W_used * K].reshape(B, E, W_used, K)
    patches = xw.transpose(0, 2, 1, 3).reshape(B, W_used, EK)
    patches = patches.reshape(B, W_pool, pool, EK).transpose(2, 0, 1, 3)
    patches = patches.reshape(pool, rows_out, EK)
    patches = jnp.pad(patches, ((0, 0), (0, rows_padded - rows_out), (0, 0)))
    patches = patches.astype(jnp.bfloat16)

    cost = pl.CostEstimate(
        flops=2 * pool * rows_padded * EK * n_pad,
        transcendentals=(pool + 1) * rows_padded * n_pad,          # tanh + sqrt
        bytes_accessed=(patches.size * 2 + w_eff.size * 2 + b_row.size * 4
                        + rows_padded * n_pad * 4),
    )

    out_padded = pl.pallas_call(
        _fused_gcn_kernel,
        out_shape=jax.ShapeDtypeStruct((rows_padded, n_pad), jnp.float32),
        grid=(num_tiles,),
        in_specs=[
            pl.BlockSpec((pool, tile_m, EK), lambda i: (0, i, 0)),
            pl.BlockSpec((EK, n_pad), lambda i: (0, 0)),
            pl.BlockSpec((1, n_pad), lambda i: (0, 0)),
        ],
        out_specs=pl.BlockSpec((tile_m, n_pad), lambda i: (i, 0)),
        compiler_params=pltpu.CompilerParams(
            dimension_semantics=("parallel",),     # lets v7x split rows across 2 TCs
            vmem_limit_bytes=32 * 1024 * 1024,
        ),
        cost_estimate=cost,
    )(patches, w_eff, b_row)

    out = out_padded[:rows_out, :emb_dim]          # drop row/column padding
    return out.reshape(B, W_pool, emb_dim)


def reference_forward(x, adj, weight, bias, pool):
    # Pure-JAX f32 reference following the PyTorch op order (no adj folding).
    B, E, T = x.shape
    emb_dim, _, _, K = weight.shape
    W = (T - K) // K + 1
    W_pool = (W - pool) // pool + 1
    mm = jnp.einsum("ef,bft->bet", adj, x)
    mm_win = mm[:, :, : W * K].reshape(B, E, W, K)
    conv = jnp.einsum("cek,bewk->bcw", weight[:, 0], mm_win) + bias[None, :, None]
    act = jnp.tanh(conv)
    sq = act * act
    pooled = sq[:, :, : W_pool * pool].reshape(B, emb_dim, W_pool, pool).sum(-1)
    return jnp.sqrt(pooled).transpose(0, 2, 1)


if __name__ == "__main__":
    # Small shapes consistent with the module: emb_dim=32, pool=2, num_elec=4, emb_kernel=8.
    B, num_elec, T = 2, 4, 64
    emb_dim, emb_kernel, pool = 32, 8, 2

    key = jax.random.PRNGKey(0)
    k1, k2, k3, k4 = jax.random.split(key, 4)
    x = jax.random.normal(k1, (B, num_elec, T), dtype=jnp.float32)
    adj = jax.random.normal(k2, (num_elec, num_elec), dtype=jnp.float32) * 0.5

    # Deterministic Conv2d parameter init (uniform in +-1/sqrt(fan_in), like PyTorch).
    fan_in = 1 * num_elec * emb_kernel
    bound = 1.0 / np.sqrt(fan_in)
    weight = jax.random.uniform(
        k3, (emb_dim, 1, num_elec, emb_kernel), dtype=jnp.float32,
        minval=-bound, maxval=bound,
    )
    bias = jax.random.uniform(
        k4, (emb_dim,), dtype=jnp.float32, minval=-bound, maxval=bound
    )

    out = graph_convolution_forward(x, adj, weight, bias, pool)
    out = jax.block_until_ready(out)

    ref = reference_forward(x, adj, weight, bias, pool)
    # bf16 MXU inputs (f32 accumulation) -> loosened tolerance vs the f32 reference.
    np.testing.assert_allclose(np.asarray(out), np.asarray(ref), rtol=2e-2, atol=2e-2)

    print("KERNEL_OK")
</pallas_src>

<mosaic_0001>
module attributes {stable_mosaic.version = 11 : i64} {
  func.func @_fused_gcn_kernel(%arg0: i32, %arg1: memref<2x8x32xbf16, #tpu.memory_space<vmem>>, %arg2: memref<32x128xbf16, #tpu.memory_space<vmem>>, %arg3: memref<1x128xf32, #tpu.memory_space<vmem>>, %arg4: memref<8x128xf32, #tpu.memory_space<vmem>>) attributes {dimension_semantics = [#tpu.dimension_semantics<parallel>], iteration_bounds = array<i64: 1>, scalar_prefetch = 0 : i64, scratch_operands = 0 : i64, tpu.core_type = #tpu.core_type<tc>, window_params = [{transform_indices = @transform_0, window_bounds = array<i64: 2, 8, 32>}, {pipeline_mode = #tpu.pipeline_mode<synchronous>, transform_indices = @transform_1, window_bounds = array<i64: 32, 128>}, {pipeline_mode = #tpu.pipeline_mode<synchronous>, transform_indices = @transform_2, window_bounds = array<i64: 1, 128>}, {transform_indices = @transform_3, window_bounds = array<i64: 8, 128>}]} {
    %c0 = arith.constant 0 : index
    %c0_0 = arith.constant 0 : index
    %0 = vector.load %arg2[%c0, %c0_0] : memref<32x128xbf16, #tpu.memory_space<vmem>>, vector<32x128xbf16>
    %c0_1 = arith.constant 0 : index
    %c0_2 = arith.constant 0 : index
    %1 = vector.load %arg3[%c0_1, %c0_2] : memref<1x128xf32, #tpu.memory_space<vmem>>, vector<1x128xf32>
    %c0_3 = arith.constant 0 : index
    %c0_4 = arith.constant 0 : index
    %c0_5 = arith.constant 0 : index
    %2 = vector.load %arg1[%c0_3, %c0_4, %c0_5] : memref<2x8x32xbf16, #tpu.memory_space<vmem>>, vector<1x8x32xbf16>
    %3 = vector.shape_cast %2 : vector<1x8x32xbf16> to vector<8x32xbf16>
    %cst = arith.constant dense<0.000000e+00> : vector<8x128xf32>
    %4 = tpu.matmul %3, %0, %cst {dimension_numbers = #tpu.dot_dimension_numbers<[1], [0], [0], [1], [0, 0, 1, 1], [], []>} : vector<8x32xbf16>, vector<32x128xbf16>, vector<8x128xf32> -> vector<8x128xf32>
    %5 = vector.broadcast %1 : vector<1x128xf32> to vector<8x128xf32>
    %6 = arith.addf %4, %5 : vector<8x128xf32>
    %7 = math.tanh %6 : vector<8x128xf32>
    %8 = arith.mulf %7, %7 : vector<8x128xf32>
    %c1 = arith.constant 1 : index
    %c0_6 = arith.constant 0 : index
    %c0_7 = arith.constant 0 : index
    %9 = vector.load %arg1[%c1, %c0_6, %c0_7] : memref<2x8x32xbf16, #tpu.memory_space<vmem>>, vector<1x8x32xbf16>
    %10 = vector.shape_cast %9 : vector<1x8x32xbf16> to vector<8x32xbf16>
    %cst_8 = arith.constant dense<0.000000e+00> : vector<8x128xf32>
    %11 = tpu.matmul %10, %0, %cst_8 {dimension_numbers = #tpu.dot_dimension_numbers<[1], [0], [0], [1], [0, 0, 1, 1], [], []>} : vector<8x32xbf16>, vector<32x128xbf16>, vector<8x128xf32> -> vector<8x128xf32>
    %12 = vector.broadcast %1 : vector<1x128xf32> to vector<8x128xf32>
    %13 = arith.addf %11, %12 : vector<8x128xf32>
    %14 = math.tanh %13 : vector<8x128xf32>
    %15 = arith.mulf %14, %14 : vector<8x128xf32>
    %16 = arith.addf %8, %15 : vector<8x128xf32>
    %17 = math.sqrt %16 : vector<8x128xf32>
    %c0_9 = arith.constant 0 : index
    %c0_10 = arith.constant 0 : index
    %18 = vector.load %arg4[%c0_9, %c0_10] : memref<8x128xf32, #tpu.memory_space<vmem>>, vector<8x128xf32>
    tpu.vector_store %arg4[%c0_9, %c0_10], %17 {strides = array<i32>} : memref<8x128xf32, #tpu.memory_space<vmem>>, vector<8x128xf32>,
    return
  }
  func.func @transform_0(%arg0: i32) -> (i32, i32, i32) {
    %c0_i32 = arith.constant 0 : i32
    %c0_i32_0 = arith.constant 0 : i32
    %c0_i32_1 = arith.constant 0 : i32
    return %c0_i32, %arg0, %c0_i32_0 : i32, i32, i32
  }
  func.func @transform_1(%arg0: i32) -> (i32, i32) {
    %c0_i32 = arith.constant 0 : i32
    %c0_i32_0 = arith.constant 0 : i32
    %c0_i32_1 = arith.constant 0 : i32
    return %c0_i32, %c0_i32_0 : i32, i32
  }
  func.func @transform_2(%arg0: i32) -> (i32, i32) {
    %c0_i32 = arith.constant 0 : i32
    %c0_i32_0 = arith.constant 0 : i32
    %c0_i32_1 = arith.constant 0 : i32
    return %c0_i32, %c0_i32_0 : i32, i32
  }
  func.func @transform_3(%arg0: i32) -> (i32, i32) {
    %c0_i32 = arith.constant 0 : i32
    %c0_i32_0 = arith.constant 0 : i32
    return %arg0, %c0_i32 : i32, i32
  }
}

</mosaic_0001>

<bundles_post_ra>
// kernel: tpu_custom_call.1
= control target key start
LH: loop header
LB: loop body
LE: loop exit
PB: predicated region body
PF: predicated region fallthrough
CT: control target
= control target key end

     0   :  { %8 = vsyncpa [#allocation3], 0  ;;  %s333_s0 = inlined_call_operand.hbm [shape: bf16[2,8,32], index: 0, kind: input, shape index: {}]   ;;  %s334_s1 = inlined_call_operand.hbm [shape: bf16[32,128], index: 1, kind: input, shape index: {}]   ;;  %s335_s2 = inlined_call_operand.vmem [shape: f32[1,128], index: 2, kind: input, shape index: {}]   ;;  %s336_s3 = inlined_call_operand.hbm [shape: f32[8,128], index: 3, kind: output, shape index: {}]  }
   0x1   :  { %9 = vsyncpa [#allocation6], 0 }
   0x2   :  { %10 = vsyncpa [#allocation4], 0  ;;  %s294_s12 = smov [#allocation2]  }
   0x3   :  { %s16_s13 = sshll.u32 %s294_s12, 4  ;;  %s17_s13 = int_to_ptr.vmem [resolvable:$true] %s16_s13 }
   0x4   :  { %s236_s14 = scalar_lea.vmem %s17_s13, 128  ;;  %p241_p1 = scmp.lt.s32.totalorder %s17_s13, %s17_s13 }
   0x5   :  { %p237_p0 = scmp.ne.s32.totalorder %s17_s13, %s236_s14  ;;  %p242_p2 = scmp.lt.s32.totalorder %s236_s14, %s236_s14 }
   0x7   :  { %p243_p3 = por %p242_p2, %p241_p1 }
   0x9   :  { %p244_p4 = pnand %p243_p3, %p237_p0 }
   0xb   :  { %247 = shalt.err (!%p244_p4)
}
   0xc   :  { %s295_s15 = smov 64   ;;  %s296_s16 = smov 4  }
   0xd   :  { %22 = dma.hbm_to_vmem [thread:$0]  %s333_s0, 128, %s17_s13, [#allocation3], %s295_s15, %s295_s15, %s296_s16  }
   0xe   :  { %s297_s19 = smov [#allocation5]  }
   0xf   :  { %s28_s20 = sshll.u32 %s297_s19, 4  ;;  %s29_s20 = int_to_ptr.vmem [resolvable:$true] %s28_s20 }
  0x10   :  { %s256_s21 = scalar_lea.vmem %s29_s20, 256  ;;  %p261_p6 = scmp.lt.s32.totalorder %s29_s20, %s29_s20 }
  0x11   :  { %p257_p5 = scmp.ne.s32.totalorder %s29_s20, %s256_s21  ;;  %p262_p7 = scmp.lt.s32.totalorder %s256_s21, %s256_s21 }
  0x13   :  { %p263_p8 = por %p262_p7, %p261_p6 }
  0x15   :  { %p264_p9 = pnand %p263_p8, %p257_p5 }
  0x17   :  { %267 = shalt.err (!%p264_p9)
}
  0x18   :  { %34 = dma.hbm_to_vmem [thread:$0]  %s334_s1, 256, %s29_s20, [#allocation6], %s295_s15, %s295_s15, %s296_s16  }
  0x19   :  { %288 = dma.done.wait [#allocation3], 128  }
  0x1a   :  { %289 = vsyncadd [#allocation3], 4294967168 }
  0x1b   :  { %290 = dma.done.wait [#allocation6], 256  }
  0x1c   :  { %291 = vsyncadd [#allocation6], 4294967040  ;;  %v298_v0 = vmov 0.0   ;;  %vm299_vm0 = vmmov 0   ;;  %v220_v1 = vld [vmem:[#allocation5 + $0x8] sm:$0xff]   ;;  %v221_v2 = vld [vmem:[#allocation5] sm:$0xff]  }
  0x1d   :  { %197 = vmatprep.subr.bf16.mxu0 %v298_v0  ;;  %205 = vmatprep.subr.bf16.mxu1 %v298_v0  ;;  %v49_v3 = vld [vmem:[#allocation2] sm:$0xf]  ;;  %vm68_vm1 = vcmask 261120   ;;  %v115_v4 = vld [vmem:[#allocation2 + $0x4] sm:$0xf] }
  0x1e   :  { %201 = vmatprep.mubr.msk.bf16.mxu0 %vm299_vm0, %v298_v0  ;;  %209 = vmatprep.mubr.msk.bf16.mxu1 %vm299_vm0, %v298_v0  ;;  %v186_v5 = vld [vmem:[%s335_s2] ss:$0 sm:$0xff]  ;;  %s300_s2 = smov [#allocation7]  }
  0x1f   :  { %198 = vmatpush3.bf16.msra.mxu0 %v220_v1  ;;  %206 = vmatpush3.bf16.msra.mxu1 %v220_v1  ;;  %s176_s24 = sshll.u32 %s300_s2, 4  ;;  %s177_s24 = int_to_ptr.vmem [resolvable:$true] %s176_s24 }
  0x20   :  { %199 = vmatprep.subr.bf16.mxu0 %v298_v0  ;;  %207 = vmatprep.subr.bf16.mxu1 %v298_v0  ;;  %s268_s25 = scalar_lea.vmem %s177_s24, 128  ;;  %p273_p11 = scmp.lt.s32.totalorder %s177_s24, %s177_s24 }
  0x21   :  { %p269_p10 = scmp.ne.s32.totalorder %s177_s24, %s268_s25  ;;  %p274_p12 = scmp.lt.s32.totalorder %s268_s25, %s268_s25 }
  0x23   :  { %200 = vmatpush3.bf16.msra.mxu0 %v221_v2  ;;  %208 = vmatpush3.bf16.msra.mxu1 %v221_v2  ;;  %p275_p13 = por %p274_p12, %p273_p11 }
  0x25   :  { %p276_p0 = pnand %p275_p13, %p269_p10 }
  0x26   :  { %202 = vmatmul.mubr.msk.bf16.vlgmr.msra.gmra.mxu0 %vm68_vm1, %v49_v3  ;;  %210 = vmatmul.mubr.msk.bf16.vlgmr.msra.gmra.mxu1 %vm68_vm1, %v115_v4 }
  0xe6   :  { %v106_v6 = vpop.f32.mrf.mxu0  ;;  %v153_v7 = vpop.f32.mrf.mxu1 }
  0xe7   :  { %v107_v8 = vadd.f32 %v186_v5, %v106_v6  ;;  %v154_v9 = vadd.f32 %v186_v5, %v153_v7 }
  0xe8   :  { %v203_v10 = vpop.f32.mrf.mxu0  ;;  %v211_v11 = vpop.f32.mrf.mxu1 }
  0xe9   :  { %222 = vtanh.f32 %v107_v8 }
  0xea   :  { %224 = vtanh.f32 %v154_v9  ;;  %v109_v12 = vpop.f32.mrf.mxu0  ;;  %v156_v13 = vpop.f32.mrf.mxu1 }
  0xec   :  { %v204_v14 = vpop.f32.mrf.mxu0  ;;  %v212_v15 = vpop.f32.mrf.mxu1 }
  0xf6   :  { %v223_v16 = vpop.eup %222 }
  0xf7   :  { %v225_v17 = vpop.eup %224  ;;  %v113_v18 = vmul.f32 %v223_v16, %v223_v16 }
  0xf8   :  { %v160_v19 = vmul.f32 %v225_v17, %v225_v17 }
  0xfa   :  { %v161_v20 = vadd.f32 %v160_v19, %v113_v18 }
  0xfc   :  { %226 = vrsqrt.f32 %v161_v20  ;;  %vm164_vm2 = vcmp.eq.f32.partialorder %v161_v20, inf  ;;  %v167_v23 = vand.u32 2147483648, %v161_v20  ;;  %vm166_vm3 = vcmp.eq.f32.partialorder %v161_v20, 0.0 }
 0x109   :  { %v227_v21 = vpop.eup %226 }
 0x10a   :  { %v163_v22 = vmul.f32 %v227_v21, %v161_v20 }
 0x10c   :  { %v165_v24 = vsel %vm164_vm2, %v161_v20, %v163_v22 }
 0x10d   :  { %v168_v25 = vsel %vm166_vm3, %v167_v23, %v165_v24 }
 0x10e   :  { %169 = vst [vmem:[#allocation7] sm:$0xff] %v168_v25 }
 0x10f   :  { %279 = shalt.err (!%p276_p0)
}
 0x110   :  { %179 = dma.vmem_to_hbm [thread:$0]  %s177_s24, 128, %s336_s3, [#allocation4]  }
 0x111   :  { %292 = dma.done.wait [#allocation4], 128  }
 0x112   :  { %293 = vsyncadd [#allocation4], 4294967168 }
 0x113   :  { %183 = vsyncpa [#allocation3], 1 }
 0x114   :  { %184 = vsyncpa [#allocation6], 1 }
 0x115   :  { %185 = vsyncpa [#allocation4], 1 }

</bundles_post_ra>
